<compile_context>
chip_gen: v5e
topology: v5e:2x2
jax: 0.10.0
libtpu: 0.0.40
codegen_flags: <defaults>
</compile_context>

<pallas_src>
import jax
import jax.numpy as jnp
from jax import lax
from jax.experimental import pallas as pl
from jax.experimental.pallas import tpu as pltpu

MARGIN = 1.0
_VMEM_LIMIT_BYTES = 32 * 1024 * 1024  # fits v5e/v6e (128 MiB phys) and v7x (64 MiB phys)


# ----------------------------- in-kernel math helpers -----------------------------
def _log_softmax(x, axis):
    m = jnp.max(x, axis=axis, keepdims=True)
    return x - (m + jnp.log(jnp.sum(jnp.exp(x - m), axis=axis, keepdims=True)))


def _per_lane_ce(log_sm, t, hard, c_axis):
    """-sum_c eff_target_c * log_softmax_c, reduced over c_axis (kept as size 1).

    hard=True : eff_target = one_hot(argmax_c t) (first-index tie break) -> pick -log_softmax at
                the argmax class. Implemented as an unrolled elementwise select over the (small)
                class axis: pure VPU, no iota / cross-lane ops.
    hard=False: eff_target = t (PyTorch CrossEntropyLoss class-probabilities path).
    """
    if not hard:
        return -jnp.sum(t * log_sm, axis=c_axis, keepdims=True)
    num_classes = t.shape[c_axis]
    tmax = jnp.max(t, axis=c_axis, keepdims=True)
    picked = jnp.zeros(tmax.shape, jnp.float32)
    taken = jnp.zeros(tmax.shape, jnp.bool_)
    for c in range(num_classes):
        tc = lax.slice_in_dim(t, c, c + 1, axis=c_axis)
        lc = lax.slice_in_dim(log_sm, c, c + 1, axis=c_axis)
        hit = jnp.logical_and(tc == tmax, jnp.logical_not(taken))
        picked = jnp.where(hit, lc, picked)
        taken = jnp.logical_or(taken, hit)
    return -picked


# ----------------------------- kernel bodies -----------------------------
def _make_fast_kernel(hard):
    """Blocks: pred/real/fake (C, s_blk, 128) with the class axis NON-minor; out (1,1,2,128)."""
    def kernel(pred_ref, real_ref, fake_ref, out_ref):
        pred = pred_ref[...].astype(jnp.float32)               # (C, s_blk, 128)
        log_sm = _log_softmax(pred, axis=0)                     # elementwise VPU over class axis

        def partial_row(t_ref):
            per = _per_lane_ce(log_sm, t_ref[...].astype(jnp.float32), hard, 0)  # (1, s_blk, 128)
            return jnp.sum(per, axis=1)                         # (1, 128) per-lane partial sums

        res = jnp.concatenate([partial_row(real_ref), partial_row(fake_ref)], axis=0)  # (2, 128)
        out_ref[...] = res.reshape(1, 1, 2, 128)
    return kernel


def _make_slow_kernel(hard):
    """Fallback for HW not divisible by 128 (small odd feature maps). Blocks: (1, C, HW)."""
    def kernel(pred_ref, real_ref, fake_ref, out_ref):
        pred = pred_ref[...].astype(jnp.float32)                # (1, C, HW)
        log_sm = _log_softmax(pred, axis=1)
        per_r = _per_lane_ce(log_sm, real_ref[...].astype(jnp.float32), hard, 1)  # (1, 1, HW)
        per_f = _per_lane_ce(log_sm, fake_ref[...].astype(jnp.float32), hard, 1)  # (1, 1, HW)
        out_ref[...] = jnp.concatenate([per_r, per_f], axis=1)  # (1, 2, HW)
    return kernel


# ----------------------------- per-scale wrappers -----------------------------
def _block_partials_fast(pred, real, fake, hard, max_block_bytes):
    """HW % 128 == 0: free reshape to (N*C, HW//128, 128); class axis non-minor in the block."""
    n, c, h, w = pred.shape
    hw = h * w
    s = hw // 128
    views = [x.reshape(n * c, s, 128) for x in (pred, real, fake)]

    # Pick the largest sublane block that (a) fits the per-input byte budget, (b) divides S, and
    # (c) is a multiple of 8 (or the full extent) so the (8,128) block rule holds.
    max_sblk = max(8, max_block_bytes // (c * 128 * 4))
    s_blk = s
    if s > max_sblk:
        for d in range(int(max_sblk), 7, -1):
            if d % 8 == 0 and s % d == 0:
                s_blk = d
                break
    ns = s // s_blk

    elems = n * c * hw
    cost = pl.CostEstimate(
        flops=int(14 * elems),
        transcendentals=int(elems + n * hw),
        bytes_accessed=int(3 * elems * pred.dtype.itemsize + n * ns * 2 * 128 * 4),
    )

    out = pl.pallas_call(
        _make_fast_kernel(hard),
        grid=(n, ns),
        in_specs=[pl.BlockSpec((c, s_blk, 128), lambda i, j: (i, j, 0))] * 3,
        out_specs=pl.BlockSpec((1, 1, 2, 128), lambda i, j: (i, j, 0, 0)),
        out_shape=jax.ShapeDtypeStruct((n, ns, 2, 128), jnp.float32),
        compiler_params=pltpu.CompilerParams(
            dimension_semantics=("parallel", "parallel"),   # per-block outputs -> no races
            vmem_limit_bytes=_VMEM_LIMIT_BYTES,
        ),
        cost_estimate=cost,
    )(*views)

    inv = 1.0 / float(n * hw)
    d_real = jnp.sum(out[:, :, 0, :]) * inv
    d_fake = jnp.sum(out[:, :, 1, :]) * inv
    return d_real, d_fake


def _block_partials_slow(pred, real, fake, hard):
    """HW % 128 != 0 (small odd feature maps): one block per sample over (1, C, HW)."""
    n, c, h, w = pred.shape
    hw = h * w
    views = [x.reshape(n, c, hw) for x in (pred, real, fake)]

    elems = n * c * hw
    cost = pl.CostEstimate(
        flops=int(14 * elems),
        transcendentals=int(elems + n * hw),
        bytes_accessed=int(3 * elems * pred.dtype.itemsize + n * 2 * hw * 4),
    )

    out = pl.pallas_call(
        _make_slow_kernel(hard),
        grid=(n,),
        in_specs=[pl.BlockSpec((1, c, hw), lambda i: (i, 0, 0))] * 3,
        out_specs=pl.BlockSpec((1, 2, hw), lambda i: (i, 0, 0)),
        out_shape=jax.ShapeDtypeStruct((n, 2, hw), jnp.float32),
        compiler_params=pltpu.CompilerParams(
            dimension_semantics=("parallel",),
            vmem_limit_bytes=_VMEM_LIMIT_BYTES,
        ),
        cost_estimate=cost,
    )(*views)

    inv = 1.0 / float(n * hw)
    d_real = jnp.sum(out[:, 0, :]) * inv
    d_fake = jnp.sum(out[:, 1, :]) * inv
    return d_real, d_fake


def samcl_loss_4(critic_outputs_real, critic_outputs_fake, critic_outputs_pred,
                 *, max_block_bytes=2 * 1024 * 1024):
    """Pallas implementation of SAMCL_Loss_4.forward."""
    assert len(critic_outputs_pred) == 4
    loss = jnp.float32(0.0)
    for i in range(4):
        pred = critic_outputs_pred[i]
        real = critic_outputs_real[i]
        fake = critic_outputs_fake[i]
        hard = (i == 0)   # scale 0: argmax-encoded hard labels (RMILoss CE component)
        n, c, h, w = pred.shape
        if (h * w) % 128 == 0:
            d_r, d_f = _block_partials_fast(pred, real, fake, hard, max_block_bytes)
        else:
            d_r, d_f = _block_partials_slow(pred, real, fake, hard)
        loss = loss + jnp.maximum(d_r - d_f + MARGIN, 0.0)
    return loss


# ---------------- pure-JAX reference (correctness sanity check) ----------------
def _ref_loss(real_list, fake_list, pred_list):
    def hard_ce(pred, target_logits):
        labels = jnp.argmax(target_logits, axis=1)                      # (N, H, W)
        ls = jax.nn.log_softmax(pred, axis=1)                           # (N, C, H, W)
        picked = jnp.take_along_axis(ls, labels[:, None], axis=1)[:, 0]
        return -jnp.mean(picked)

    def soft_ce(pred, target):
        ls = jax.nn.log_softmax(pred, axis=1)
        return jnp.mean(-jnp.sum(target * ls, axis=1))

    loss = jnp.maximum(
        hard_ce(pred_list[0], real_list[0]) - hard_ce(pred_list[0], fake_list[0]) + MARGIN, 0.0)
    for i in range(1, 4):
        loss = loss + jnp.maximum(
            soft_ce(pred_list[i], real_list[i]) - soft_ce(pred_list[i], fake_list[i]) + MARGIN,
            0.0)
    return loss


if __name__ == "__main__":
    key = jax.random.PRNGKey(0)
    N, C = 2, 4
    # Multi-scale critic outputs (x0..x3), NCHW like the PyTorch module. Mixes 128-divisible
    # spatial sizes (fast, class-non-minor layout) and a small odd one (fallback layout).
    shapes = [(N, C, 64, 64), (N, C, 32, 32), (N, C, 16, 16), (N, C, 8, 8)]

    keys = jax.random.split(key, 3 * len(shapes))
    real = tuple(jax.random.normal(keys[i], s, jnp.float32) for i, s in enumerate(shapes))
    fake = tuple(jax.random.normal(keys[4 + i], s, jnp.float32) for i, s in enumerate(shapes))
    pred = tuple(jax.random.normal(keys[8 + i], s, jnp.float32) for i, s in enumerate(shapes))

    # Small block byte budget so scale 0 exercises the multi-block, fully-parallel grid path
    # at this test size (production default is 2 MiB per input block).
    loss = samcl_loss_4(real, fake, pred, max_block_bytes=16 * 1024)
    jax.block_until_ready(loss)

    ref = _ref_loss(real, fake, pred)
    assert jnp.allclose(loss, ref, rtol=1e-5, atol=1e-5), (loss, ref)

    print("KERNEL_OK")
</pallas_src>

<mosaic_0001>
module attributes {stable_mosaic.version = 11 : i64} {
  func.func @kernel(%arg0: i32, %arg1: i32, %arg2: memref<4x8x128xf32, #tpu.memory_space<vmem>>, %arg3: memref<4x8x128xf32, #tpu.memory_space<vmem>>, %arg4: memref<4x8x128xf32, #tpu.memory_space<vmem>>, %arg5: memref<1x1x2x128xf32, #tpu.memory_space<vmem>>) attributes {dimension_semantics = [#tpu.dimension_semantics<parallel>, #tpu.dimension_semantics<parallel>], iteration_bounds = array<i64: 2, 4>, scalar_prefetch = 0 : i64, scratch_operands = 0 : i64, tpu.core_type = #tpu.core_type<tc>, window_params = [{transform_indices = @transform_0, window_bounds = array<i64: 4, 8, 128>}, {transform_indices = @transform_1, window_bounds = array<i64: 4, 8, 128>}, {transform_indices = @transform_2, window_bounds = array<i64: 4, 8, 128>}, {transform_indices = @transform_3, window_bounds = array<i64: 1, 1, 2, 128>}]} {
    %c0 = arith.constant 0 : index
    %c0_0 = arith.constant 0 : index
    %c0_1 = arith.constant 0 : index
    %0 = vector.load %arg2[%c0, %c0_0, %c0_1] : memref<4x8x128xf32, #tpu.memory_space<vmem>>, vector<4x8x128xf32>
    %cst = arith.constant dense<0xFF800000> : vector<8x128xf32>
    %1 = vector.multi_reduction <maximumf>, %0, %cst [0] : vector<4x8x128xf32> to vector<8x128xf32>
    %2 = vector.shape_cast %1 : vector<8x128xf32> to vector<1x8x128xf32>
    %3 = vector.broadcast %2 : vector<1x8x128xf32> to vector<4x8x128xf32>
    %4 = arith.subf %0, %3 : vector<4x8x128xf32>
    %5 = math.exp %4 : vector<4x8x128xf32>
    %cst_2 = arith.constant dense<0.000000e+00> : vector<8x128xf32>
    %6 = vector.multi_reduction <add>, %5, %cst_2 [0] : vector<4x8x128xf32> to vector<8x128xf32>
    %7 = vector.shape_cast %6 : vector<8x128xf32> to vector<1x8x128xf32>
    %8 = math.log %7 : vector<1x8x128xf32>
    %9 = arith.addf %2, %8 : vector<1x8x128xf32>
    %10 = vector.broadcast %9 : vector<1x8x128xf32> to vector<4x8x128xf32>
    %11 = arith.subf %0, %10 : vector<4x8x128xf32>
    %c0_3 = arith.constant 0 : index
    %c0_4 = arith.constant 0 : index
    %c0_5 = arith.constant 0 : index
    %12 = vector.load %arg3[%c0_3, %c0_4, %c0_5] : memref<4x8x128xf32, #tpu.memory_space<vmem>>, vector<4x8x128xf32>
    %cst_6 = arith.constant dense<0xFF800000> : vector<8x128xf32>
    %13 = vector.multi_reduction <maximumf>, %12, %cst_6 [0] : vector<4x8x128xf32> to vector<8x128xf32>
    %14 = vector.shape_cast %13 : vector<8x128xf32> to vector<1x8x128xf32>
    %cst_7 = arith.constant 0.000000e+00 : f32
    %15 = vector.broadcast %cst_7 : f32 to vector<1x8x128xf32>
    %false = arith.constant false
    %16 = vector.broadcast %false : i1 to vector<1x8x128xi1>
    %17 = vector.extract_strided_slice %12 {offsets = [0, 0, 0], sizes = [1, 8, 128], strides = [1, 1, 1]} : vector<4x8x128xf32> to vector<1x8x128xf32>
    %18 = vector.extract_strided_slice %11 {offsets = [0, 0, 0], sizes = [1, 8, 128], strides = [1, 1, 1]} : vector<4x8x128xf32> to vector<1x8x128xf32>
    %19 = arith.cmpf oeq, %17, %14 : vector<1x8x128xf32>
    %cst_8 = arith.constant dense<true> : vector<1x8x128xi1>
    %20 = arith.xori %16, %cst_8 : vector<1x8x128xi1>
    %21 = arith.andi %19, %20 : vector<1x8x128xi1>
    %22 = arith.select %21, %18, %15 : vector<1x8x128xi1>, vector<1x8x128xf32>
    %23 = arith.ori %16, %21 : vector<1x8x128xi1>
    %24 = vector.extract_strided_slice %12 {offsets = [1, 0, 0], sizes = [1, 8, 128], strides = [1, 1, 1]} : vector<4x8x128xf32> to vector<1x8x128xf32>
    %25 = vector.extract_strided_slice %11 {offsets = [1, 0, 0], sizes = [1, 8, 128], strides = [1, 1, 1]} : vector<4x8x128xf32> to vector<1x8x128xf32>
    %26 = arith.cmpf oeq, %24, %14 : vector<1x8x128xf32>
    %cst_9 = arith.constant dense<true> : vector<1x8x128xi1>
    %27 = arith.xori %23, %cst_9 : vector<1x8x128xi1>
    %28 = arith.andi %26, %27 : vector<1x8x128xi1>
    %29 = arith.select %28, %25, %22 : vector<1x8x128xi1>, vector<1x8x128xf32>
    %30 = arith.ori %23, %28 : vector<1x8x128xi1>
    %31 = vector.extract_strided_slice %12 {offsets = [2, 0, 0], sizes = [1, 8, 128], strides = [1, 1, 1]} : vector<4x8x128xf32> to vector<1x8x128xf32>
    %32 = vector.extract_strided_slice %11 {offsets = [2, 0, 0], sizes = [1, 8, 128], strides = [1, 1, 1]} : vector<4x8x128xf32> to vector<1x8x128xf32>
    %33 = arith.cmpf oeq, %31, %14 : vector<1x8x128xf32>
    %cst_10 = arith.constant dense<true> : vector<1x8x128xi1>
    %34 = arith.xori %30, %cst_10 : vector<1x8x128xi1>
    %35 = arith.andi %33, %34 : vector<1x8x128xi1>
    %36 = arith.select %35, %32, %29 : vector<1x8x128xi1>, vector<1x8x128xf32>
    %37 = arith.ori %30, %35 : vector<1x8x128xi1>
    %38 = vector.extract_strided_slice %12 {offsets = [3, 0, 0], sizes = [1, 8, 128], strides = [1, 1, 1]} : vector<4x8x128xf32> to vector<1x8x128xf32>
    %39 = vector.extract_strided_slice %11 {offsets = [3, 0, 0], sizes = [1, 8, 128], strides = [1, 1, 1]} : vector<4x8x128xf32> to vector<1x8x128xf32>
    %40 = arith.cmpf oeq, %38, %14 : vector<1x8x128xf32>
    %cst_11 = arith.constant dense<true> : vector<1x8x128xi1>
    %41 = arith.xori %37, %cst_11 : vector<1x8x128xi1>
    %42 = arith.andi %40, %41 : vector<1x8x128xi1>
    %43 = arith.select %42, %39, %36 : vector<1x8x128xi1>, vector<1x8x128xf32>
    %cst_12 = arith.constant 0.000000e+00 : f32
    %44 = vector.broadcast %cst_12 : f32 to vector<1x8x128xf32>
    %45 = arith.subf %44, %43 : vector<1x8x128xf32>
    %cst_13 = arith.constant dense<0.000000e+00> : vector<1x128xf32>
    %46 = vector.multi_reduction <add>, %45, %cst_13 [1] : vector<1x8x128xf32> to vector<1x128xf32>
    %c0_14 = arith.constant 0 : index
    %c0_15 = arith.constant 0 : index
    %c0_16 = arith.constant 0 : index
    %47 = vector.load %arg4[%c0_14, %c0_15, %c0_16] : memref<4x8x128xf32, #tpu.memory_space<vmem>>, vector<4x8x128xf32>
    %cst_17 = arith.constant dense<0xFF800000> : vector<8x128xf32>
    %48 = vector.multi_reduction <maximumf>, %47, %cst_17 [0] : vector<4x8x128xf32> to vector<8x128xf32>
    %49 = vector.shape_cast %48 : vector<8x128xf32> to vector<1x8x128xf32>
    %cst_18 = arith.constant 0.000000e+00 : f32
    %50 = vector.broadcast %cst_18 : f32 to vector<1x8x128xf32>
    %false_19 = arith.constant false
    %51 = vector.broadcast %false_19 : i1 to vector<1x8x128xi1>
    %52 = vector.extract_strided_slice %47 {offsets = [0, 0, 0], sizes = [1, 8, 128], strides = [1, 1, 1]} : vector<4x8x128xf32> to vector<1x8x128xf32>
    %53 = vector.extract_strided_slice %11 {offsets = [0, 0, 0], sizes = [1, 8, 128], strides = [1, 1, 1]} : vector<4x8x128xf32> to vector<1x8x128xf32>
    %54 = arith.cmpf oeq, %52, %49 : vector<1x8x128xf32>
    %cst_20 = arith.constant dense<true> : vector<1x8x128xi1>
    %55 = arith.xori %51, %cst_20 : vector<1x8x128xi1>
    %56 = arith.andi %54, %55 : vector<1x8x128xi1>
    %57 = arith.select %56, %53, %50 : vector<1x8x128xi1>, vector<1x8x128xf32>
    %58 = arith.ori %51, %56 : vector<1x8x128xi1>
    %59 = vector.extract_strided_slice %47 {offsets = [1, 0, 0], sizes = [1, 8, 128], strides = [1, 1, 1]} : vector<4x8x128xf32> to vector<1x8x128xf32>
    %60 = vector.extract_strided_slice %11 {offsets = [1, 0, 0], sizes = [1, 8, 128], strides = [1, 1, 1]} : vector<4x8x128xf32> to vector<1x8x128xf32>
    %61 = arith.cmpf oeq, %59, %49 : vector<1x8x128xf32>
    %cst_21 = arith.constant dense<true> : vector<1x8x128xi1>
    %62 = arith.xori %58, %cst_21 : vector<1x8x128xi1>
    %63 = arith.andi %61, %62 : vector<1x8x128xi1>
    %64 = arith.select %63, %60, %57 : vector<1x8x128xi1>, vector<1x8x128xf32>
    %65 = arith.ori %58, %63 : vector<1x8x128xi1>
    %66 = vector.extract_strided_slice %47 {offsets = [2, 0, 0], sizes = [1, 8, 128], strides = [1, 1, 1]} : vector<4x8x128xf32> to vector<1x8x128xf32>
    %67 = vector.extract_strided_slice %11 {offsets = [2, 0, 0], sizes = [1, 8, 128], strides = [1, 1, 1]} : vector<4x8x128xf32> to vector<1x8x128xf32>
    %68 = arith.cmpf oeq, %66, %49 : vector<1x8x128xf32>
    %cst_22 = arith.constant dense<true> : vector<1x8x128xi1>
    %69 = arith.xori %65, %cst_22 : vector<1x8x128xi1>
    %70 = arith.andi %68, %69 : vector<1x8x128xi1>
    %71 = arith.select %70, %67, %64 : vector<1x8x128xi1>, vector<1x8x128xf32>
    %72 = arith.ori %65, %70 : vector<1x8x128xi1>
    %73 = vector.extract_strided_slice %47 {offsets = [3, 0, 0], sizes = [1, 8, 128], strides = [1, 1, 1]} : vector<4x8x128xf32> to vector<1x8x128xf32>
    %74 = vector.extract_strided_slice %11 {offsets = [3, 0, 0], sizes = [1, 8, 128], strides = [1, 1, 1]} : vector<4x8x128xf32> to vector<1x8x128xf32>
    %75 = arith.cmpf oeq, %73, %49 : vector<1x8x128xf32>
    %cst_23 = arith.constant dense<true> : vector<1x8x128xi1>
    %76 = arith.xori %72, %cst_23 : vector<1x8x128xi1>
    %77 = arith.andi %75, %76 : vector<1x8x128xi1>
    %78 = arith.select %77, %74, %71 : vector<1x8x128xi1>, vector<1x8x128xf32>
    %cst_24 = arith.constant 0.000000e+00 : f32
    %79 = vector.broadcast %cst_24 : f32 to vector<1x8x128xf32>
    %80 = arith.subf %79, %78 : vector<1x8x128xf32>
    %cst_25 = arith.constant dense<0.000000e+00> : vector<1x128xf32>
    %81 = vector.multi_reduction <add>, %80, %cst_25 [1] : vector<1x8x128xf32> to vector<1x128xf32>
    %82 = tpu.concatenate %46, %81 in 0 : vector<1x128xf32>, vector<1x128xf32> -> vector<2x128xf32>
    %83 = vector.shape_cast %82 : vector<2x128xf32> to vector<1x1x2x128xf32>
    %c0_26 = arith.constant 0 : index
    %c0_27 = arith.constant 0 : index
    %c0_28 = arith.constant 0 : index
    %c0_29 = arith.constant 0 : index
    %84 = vector.load %arg5[%c0_26, %c0_27, %c0_28, %c0_29] : memref<1x1x2x128xf32, #tpu.memory_space<vmem>>, vector<1x1x2x128xf32>
    tpu.vector_store %arg5[%c0_26, %c0_27, %c0_28, %c0_29], %83 {strides = array<i32>} : memref<1x1x2x128xf32, #tpu.memory_space<vmem>>, vector<1x1x2x128xf32>,
    return
  }
  func.func @transform_0(%arg0: i32, %arg1: i32) -> (i32, i32, i32) {
    %c0_i32 = arith.constant 0 : i32
    %c0_i32_0 = arith.constant 0 : i32
    return %arg0, %arg1, %c0_i32 : i32, i32, i32
  }
  func.func @transform_1(%arg0: i32, %arg1: i32) -> (i32, i32, i32) {
    %c0_i32 = arith.constant 0 : i32
    %c0_i32_0 = arith.constant 0 : i32
    return %arg0, %arg1, %c0_i32 : i32, i32, i32
  }
  func.func @transform_2(%arg0: i32, %arg1: i32) -> (i32, i32, i32) {
    %c0_i32 = arith.constant 0 : i32
    %c0_i32_0 = arith.constant 0 : i32
    return %arg0, %arg1, %c0_i32 : i32, i32, i32
  }
  func.func @transform_3(%arg0: i32, %arg1: i32) -> (i32, i32, i32, i32) {
    %c0_i32 = arith.constant 0 : i32
    %c0_i32_0 = arith.constant 0 : i32
    %c0_i32_1 = arith.constant 0 : i32
    return %arg0, %arg1, %c0_i32, %c0_i32_0 : i32, i32, i32, i32
  }
}

</mosaic_0001>

<bundles_post_ra>
// kernel: tpu_custom_call.1
= control target key start
LH: loop header
LB: loop body
LE: loop exit
PB: predicated region body
PF: predicated region fallthrough
CT: control target
= control target key end

     0   :  { %s1170_s0 = inlined_call_operand.hbm [shape: f32[8,32,128], index: 0, kind: input, shape index: {}]   ;;  %s1171_s1 = inlined_call_operand.hbm [shape: f32[8,32,128], index: 1, kind: input, shape index: {}]   ;;  %s1172_s2 = inlined_call_operand.hbm [shape: f32[8,32,128], index: 2, kind: input, shape index: {}]   ;;  %s1173_s3 = inlined_call_operand.hbm [shape: f32[2,4,2,128], index: 3, kind: output, shape index: {}]  }
   0x1   :  { %1183 = sst [smem:[#allocation21_spill]] %s1171_s1 }
   0x2   :  { %8 = vsyncpa [#allocation3], 0 }
   0x3   :  { %10 = vsyncpa [#allocation3 + $0x1], 0 }
   0x4   :  { %11 = vsyncpa [#allocation6], 0 }
   0x5   :  { %13 = vsyncpa [#allocation6 + $0x1], 0 }
   0x6   :  { %14 = vsyncpa [#allocation4], 0 }
   0x7   :  { %16 = vsyncpa [#allocation4 + $0x1], 0  ;;  %s892_s12 = smov 0   ;;  %s894_s13 = smov 0  }
   0x8   :  { %s896_s14 = smov 0   ;;  %s898_s15 = smov 0  }
   0x9   :  { %s900_s16 = smov 0   ;;  %s902_s17 = smov 0  }
   0xa   :  { %s904_s18 = smov 0   ;;  %s906_s19 = smov 0  }
   0xb LB: > { %1184 = sst [smem:[#allocation12_spill]] %s838_s12  ;;  %s933_s20 = sadd.s32 4294967295, %s866_s19   ;;  %s866_s19 = sphi %s906_s19, %s22_s19   ;;  %s862_s18 = sphi %s904_s18, %s1220_s18   ;;  %s858_s17 = sphi %s902_s17, %s1223_s17   ;;  %s854_s16 = sphi %s900_s16, %s1218_s16   ;;  %s850_s15 = sphi %s898_s15, %s1217_s15   ;;  %s846_s14 = sphi %s896_s14, %s1216_s14   ;;  %s842_s13 = sphi %s894_s13, %s1222_s13   ;;  %s838_s12 = sphi %s892_s12, %s1221_s12  }
   0xc   : > { %1185 = sst [smem:[#allocation13_spill]] %s846_s14  ;;  %s544_s21 = sadd.s32 4294967294, %s866_s19  }
   0xd   : > { %1186 = sst [smem:[#allocation14_spill]] %s858_s17  ;;  %s31_s22 = sadd.s32 1, %s858_s17 }
   0xe   : > { %1187 = sst [smem:[#allocation15_spill]] %s862_s18  ;;  %s34_s23 = sadd.s32 1, %s862_s18 }
   0xf   : > { %1188 = sst [smem:[#allocation16_spill]] %s866_s19  ;;  %p32_p0 = scmp.ge.s32.totalorder %s31_s22, 4 }
  0x10   : > { %s43_s24 = sadd.s32 1, %s846_s14  ;;  %p50_p1 = scmp.ne.s32.totalorder %s846_s14, %s842_s13 }
  0x11   : > { %p51_p2 = scmp.eq.s32.totalorder %s866_s19, 0  ;;  %s1225_s22 = smov (%p32_p0, %s31_s22), 0 }
  0x12   : > { %1189 = sst [smem:[#allocation17_spill]] %s1225_s22  ;;  %s1227_s23 = smov (!%p32_p0, %s34_s23), %s862_s18 }
  0x13   : > { %s39_s25 = ssub.s32 %s858_s17, %s1225_s22  ;;  %p947_p3 = por %p51_p2, %p50_p1 }
  0x14   : > { %p36_p4 = scmp.ge.s32.totalorder %s1227_s23, 2  ;;  %p56_p5 = scmp.ne.s32.totalorder %s842_s13, %s838_s12 }
  0x15   : > { %p57_p6 = scmp.eq.s32.totalorder %s933_s20, 0  ;;  %p138_p7 = scmp.eq.s32.totalorder %s933_s20, 7 }
  0x16   : > { %s1229_s23 = smov (%p36_p4, %s1227_s23), 0  ;;  %p144_p10 = scmp.eq.s32.totalorder %s544_s21, 7 }
  0x17   : > { %1191 = sst [smem:[#allocation18_spill]] %s1229_s23  ;;  %p957_p8 = por %p57_p6, %p56_p5 }
  0x18   : > { %p961_p9 = por %p138_p7, %p50_p1  ;;  %s38_s29 = ssub.s32 %s862_s18, %s1229_s23 }
  0x19   : > { %s40_s30 = sor.u32 %s39_s25, %s38_s29  ;;  %p967_p12 = por %p144_p10, %p56_p5 }
  0x1a   : > { %p41_p11 = scmp.eq.s32.totalorder %s40_s30, 0  ;;  %p594_p13 = scmp.lt.s32.totalorder %s866_s19, 8 }
  0x1b   : > { %s1194_s4 = scalar_select %p967_p12, 1, 0 }
  0x1c   : > { %s164_s5 = sand.u32 1, %s846_s14   ;;  %s569_s8 = sshll.u32 %s862_s18, 4 }
  0x1d   : > { %1195 = sst [smem:[#allocation19_spill]] %s1194_s4  ;;  %s976_s7 = sshll.u32 %s164_s5, 5 }
  0x1e   : > { %s974_s6 = scalar_select %p41_p11, %s846_s14, %s43_s24  }
  0x1f   : > { %s173_s9 = sadd.s32 %s858_s17, %s569_s8  ;;  %p982_p0 = pnand %p594_p13, %p947_p3 }
  0x20   : > { %1196 = sst [smem:[#allocation20_spill]] %s974_s6  ;;  %s550_s11 = sshll.u32 %s173_s9, 3 }
  0x21   : > { %s188_s21 = sand.u32 1, %s866_s19   ;;  %s1198_s1 = sld [smem:[#allocation21_spill]] }
  0x22   : > { %s192_s30 = scalar_lea.vmem [#allocation5], %s976_s7  ;;  %p559_p1 = scmp.ge.s32.totalorder %s866_s19, 1 }
  0x23   : > { %s202_s23 = sshll.u32 %s192_s30, 4  ;;  %s189_s26 = scalar_lea.sflag [#allocation6], %s188_s21  ;;  %s203_s23 = int_to_ptr.vmem [resolvable:$true] %s202_s23 }
  0x24   : > { %s868_s8 = smov 512   ;;  %s869_s18 = smov 128  }
  0x25   : > { %s870_s17 = smov 8   ;;  %p234_p2 = scmp.lt.s32.totalorder %s866_s19, 9 }
  0x26   : > { %s168_s30 = scalar_lea.vmem [#allocation2], %s976_s7  ;;  %s165_s21 = scalar_lea.sflag [#allocation3], %s164_s5 }
  0x27   : > { %s199_s24 = scalar_lea.hbm %s1198_s1, %s550_s11  ;;  %p995_p3 = pnand %p559_p1, %p234_p2 }
  0x28   : > { %s200_s22 = sshll.u32 %s199_s24, 4  ;;  %s175_s24 = scalar_lea.hbm %s1170_s0, %s550_s11  ;;  %s201_s22 = int_to_ptr.hbm [resolvable:$true] %s200_s22 }
  0x29   : > { %586 = dma.hbm_to_vmem [thread:$0]  (!%p982_p0), %s201_s22, 512, %s203_s23, %s189_s26, %s868_s8, %s869_s18, %s870_s17  }
  0x2a   : > { %s178_s1 = sshll.u32 %s168_s30, 4  ;;  %s176_s6 = sshll.u32 %s175_s24, 4  ;;  %s179_s1 = int_to_ptr.vmem [resolvable:$true] %s178_s1  ;;  %s177_s6 = int_to_ptr.hbm [resolvable:$true] %s176_s6 }
  0x2b   : > { %583 = dma.hbm_to_vmem [thread:$0]  (!%p982_p0), %s177_s6, 512, %s179_s1, %s165_s21, %s868_s8, %s869_s18, %s870_s17  }
  0x2c   : > { %s223_s23 = scalar_lea.hbm %s1172_s2, %s550_s11  ;;  %s216_s4 = scalar_lea.vmem [#allocation7], %s976_s7 }
  0x2d   : > { %s226_s12 = sshll.u32 %s216_s4, 4  ;;  %s224_s19 = sshll.u32 %s223_s23, 4  ;;  %s227_s12 = int_to_ptr.vmem [resolvable:$true] %s226_s12  ;;  %s225_s19 = int_to_ptr.hbm [resolvable:$true] %s224_s19 }
  0x2e   : > { %589 = dma.hbm_to_vmem [thread:$0]  (!%p982_p0), %s225_s19, 512, %s227_s12, %s189_s26, %s868_s8, %s869_s18, %s870_s17  }
  0x2f   : > { %238 = sbr.rel (%p995_p3) target bundleno = 115 (0x73), region = 32  ;;  %s1014_s25 = sand.u32 (!%p995_p3), 1, %s842_s13  }
  0x30   : > { %s560_s1 = sshll.u32 (!%p995_p3), %s1014_s25, 5  ;;  %s241_s5 = scalar_lea.sflag (!%p995_p3), [#allocation3], %s1014_s25 }
  0x31   : > { %s244_s14 = scalar_lea.vmem (!%p995_p3), [#allocation2], %s560_s1 }
  0x34   : > { %825 = dma.done.wait (%p957_p8), %s241_s5, 512  }
  0x35   : > { %827 = vsyncadd (%p957_p8), %s241_s5, 4294966784  ;;  %s250_s12 = sand.u32 1, %s933_s20   ;;  %s254_s18 = scalar_lea.vmem [#allocation5], %s560_s1 }
  0x36   : > { %s251_s17 = scalar_lea.sflag [#allocation6], %s250_s12 }
  0x37   : > { %829 = dma.done.wait (%p957_p8), %s251_s17, 1024  }
  0x38   : > { %831 = vsyncadd (%p957_p8), %s251_s17, 4294966272  ;;  %v1027_v0 = vld [vmem:[%s244_s14] sm:$0xff]  ;;  %v1029_v1 = vld [vmem:[%s244_s14 + $0x8] sm:$0xff]  ;;  %s264_s19 = scalar_lea.vmem [#allocation7], %s560_s1  ;;  %vm871_vm3 = vmmov 1   ;;  %s565_s20 = sshll.u32 %s854_s16, 2 }
  0x39   : > { %v1031_v2 = vld [vmem:[%s244_s14 + $0x10] sm:$0xff]  ;;  %v1033_v3 = vld [vmem:[%s244_s14 + $0x18] sm:$0xff]  ;;  %v305_v4 = vmax.f32 %v1027_v0, %v1029_v1  ;;  %v1037_v5 = vld [vmem:[%s254_s18] sm:$0xff]  ;;  %s404_s27 = sadd.s32 %s850_s15, %s565_s20  ;;  %s563_s4 = sshll.u32 %s1014_s25, 1 }
  0x3a   : > { %v331_v6 = vld [vmem:[%s254_s18 + $0x8] sm:$0xff]  ;;  %v306_v7 = vmax.f32 %v1031_v2, %v1033_v3  ;;  %v332_v8 = vld [vmem:[%s254_s18 + $0x10] sm:$0xff]  ;;  %v1041_v9 = vld [vmem:[%s254_s18 + $0x18] sm:$0xff]  ;;  %s566_s6 = sshll.u32 %s404_s27, 1  ;;  %s297_s16 = scalar_lea.vmem [#allocation8], %s563_s4 }
  0x3b   : > { %v1043_v10 = vld [vmem:[%s264_s19] sm:$0xff]  ;;  %v361_v11 = vld [vmem:[%s264_s19 + $0x8] sm:$0xff]  ;;  %v362_v12 = vld [vmem:[%s264_s19 + $0x10] sm:$0xff]  ;;  %v334_v15 = vmax.f32 %v1037_v5, %v331_v6  ;;  %v335_v16 = vmax.f32 %v332_v8, %v1041_v9  ;;  %s406_s11 = scalar_lea.hbm %s1173_s3, %s566_s6  ;;  %s408_s15 = sshll.u32 %s297_s16, 4  ;;  %s409_s15 = int_to_ptr.vmem [resolvable:$true] %s408_s15 }
  0x3c   : > { %v363_v13 = vld [vmem:[%s264_s19 + $0x18] sm:$0xff]  ;;  %v307_v14 = vmax.f32 %v305_v4, %v306_v7  ;;  %v364_v17 = vmax.f32 %v1043_v10, %v361_v11  ;;  %s410_s26 = sshll.u32 %s406_s11, 4  ;;  %s394_s8 = scalar_lea.sflag [#allocation4], %s1014_s25  ;;  %s411_s26 = int_to_ptr.hbm [resolvable:$true] %s410_s26 }
  0x3d   : > { %v365_v18 = vmax.f32 %v362_v12, %v363_v13  ;;  %v336_v26 = vmax.f32 %v334_v15, %v335_v16  ;;  %s778_s9 = sshra.s32 %s411_s26, 4  ;;  %s784_s21 = scalar_lea.hbm %s1173_s3, 16  ;;  %s779_s9 = int_to_ptr.hbm [resolvable:$true] %s778_s9 }
  0x3e   : > { %v308_v19 = vsub.f32 %v1027_v0, %v307_v14  ;;  %v309_v20 = vsub.f32 %v1029_v1, %v307_v14  ;;  %v310_v21 = vsub.f32 %v1031_v2, %v307_v14  ;;  %v311_v22 = vsub.f32 %v1033_v3, %v307_v14  ;;  %s780_s29 = scalar_lea.hbm %s779_s9, 2  ;;  %p785_p7 = scmp.lt.s32.totalorder %s779_s9, %s1173_s3 }
  0x3f   : > { %v366_v28 = vmax.f32 %v364_v17, %v365_v18  ;;  %vm337_vm0 = vcmp.eq.f32.partialorder %v1037_v5, %v336_v26  ;;  %vm339_vm2 = vcmp.eq.f32.partialorder %v331_v6, %v336_v26  ;;  %vm344_vm11 = vcmp.eq.f32.partialorder %v332_v8, %v336_v26  ;;  %p781_p4 = scmp.ne.s32.totalorder %s779_s9, %s780_s29  ;;  %p786_p8 = scmp.lt.s32.totalorder %s784_s21, %s780_s29 }
  0x40   : > { %v312_v23 = vmul.f32 1.442695, %v308_v19  ;;  %v314_v24 = vmul.f32 1.442695, %v309_v20  ;;  %v316_v25 = vmul.f32 1.442695, %v310_v21  ;;  %vm340_vm4 = vmxor %vm337_vm0, %vm871_vm3 }
  0x41   : > { %v318_v27 = vmul.f32 1.442695, %v311_v22  ;;  %vm367_vm1 = vcmp.eq.f32.partialorder %v1043_v10, %v366_v28  ;;  %vm369_vm5 = vcmp.eq.f32.partialorder %v361_v11, %v366_v28  ;;  %vm1060_vm7 = vmand %vm339_vm2, %vm340_vm4  ;;  %vm374_vm13 = vcmp.eq.f32.partialorder %v362_v12, %v366_v28  ;;  %p782_p5 = pnand %p781_p4, %p961_p9  ;;  %p787_p10 = por %p786_p8, %p785_p7 }
  0x42   : > { %664 = vpow2.f32 %v312_v23  ;;  %vm370_vm6 = vmxor %vm367_vm1, %vm871_vm3 }
  0x43   : > { %666 = vpow2.f32 %v314_v24  ;;  %vm1064_vm8 = vmand %vm369_vm5, %vm370_vm6  ;;  %vm349_vm6 = vcmp.eq.f32.partialorder %v1041_v9, %v336_v26  ;;  %p783_p6 = pneg %p782_p5 }
  0x44   : > { %668 = vpow2.f32 %v316_v25  ;;  %vm1072_vm9 = vmor %vm337_vm0, %vm1060_vm7 }
  0x45   : > { %670 = vpow2.f32 %v318_v27  ;;  %vm1080_vm10 = vmor %vm367_vm1, %vm1064_vm8  ;;  %p788_p11 = pnand %p787_p10, %p783_p6 }
  0x46   : > { %vm345_vm12 = vmxor %vm1072_vm9, %vm871_vm3 }
  0x47   : > { %vm375_vm14 = vmxor %vm1080_vm10, %vm871_vm3 }
  0x48   : > { %v665_v29 = vpop.eup %664  ;;  %vm1090_vm15 = vmand %vm344_vm11, %vm345_vm12  ;;  %vm379_vm12 = vcmp.eq.f32.partialorder %v363_v13, %v366_v28 }
  0x49   : > { %v667_v30 = vpop.eup %666  ;;  %vm1094_vm2 = vmand %vm374_vm13, %vm375_vm14 }
  0x4a   : > { %v669_v31 = vpop.eup %668  ;;  %v320_v32 = vadd.f32 %v667_v30, %v665_v29  ;;  %vm348_vm4 = vmor %vm1072_vm9, %vm1090_vm15 }
  0x4b   : > { %v671_v34 = vpop.eup %670  ;;  %vm378_vm5 = vmor %vm1080_vm10, %vm1094_vm2 }
  0x4c   : > { %v321_v36 = vadd.f32 %v669_v31, %v320_v32  ;;  %vm350_vm11 = vmxor %vm348_vm4, %vm871_vm3 }
  0x4d   : > { %vm380_vm13 = vmxor %vm378_vm5, %vm871_vm3 }
  0x4e   : > { %v322_v38 = vadd.f32 %v671_v34, %v321_v36  ;;  %vm351_vm9 = vmand %vm349_vm6, %vm350_vm11 }
  0x4f   : > { %vm381_vm10 = vmand %vm379_vm12, %vm380_vm13 }
  0x50   : > { %672 = vlog2.f32 %v322_v38 }
  0x56   : > { %v673_v42 = vpop.eup %672 }
  0x57   : > { %v324_v43 = vmul.f32 0.6931472, %v673_v42 }
  0x59   : > { %v325_v44 = vadd.f32 %v324_v43, %v307_v14 }
  0x5b   : > { %v326_v45 = vsub.f32 %v1027_v0, %v325_v44  ;;  %v327_v46 = vsub.f32 %v1029_v1, %v325_v44  ;;  %v328_v47 = vsub.f32 %v1031_v2, %v325_v44  ;;  %v329_v48 = vsub.f32 %v1033_v3, %v325_v44 }
  0x5d   : > { %v338_v49 = vsel %vm337_vm0, %v326_v45, 0.0  ;;  %v368_v50 = vsel %vm367_vm1, %v326_v45, 0.0  ;;  %vm390_vm0 = vcmask 1040384  }
  0x5e   : > { %v342_v51 = vsel %vm1060_vm7, %v327_v46, %v338_v49  ;;  %v372_v52 = vsel %vm1064_vm8, %v327_v46, %v368_v50 }
  0x5f   : > { %v347_v53 = vsel %vm1090_vm15, %v328_v47, %v342_v51  ;;  %v377_v54 = vsel %vm1094_vm2, %v328_v47, %v372_v52 }
  0x60   : > { %v352_v55 = vsel %vm351_vm9, %v329_v48, %v347_v53  ;;  %v382_v56 = vsel %vm381_vm10, %v329_v48, %v377_v54 }
  0x61   : > { %v353_v57 = vsub.f32 0.0, %v352_v55  ;;  %v383_v58 = vsub.f32 0.0, %v382_v56 }
  0x63   : > { %v354_v59 = vrot.slane %v353_v57, 4  ;;  %v384_v60 = vrot.slane %v383_v58, 4 }
  0x65   : > { %v355_v61 = vadd.f32 %v354_v59, %v353_v57  ;;  %v385_v62 = vadd.f32 %v384_v60, %v383_v58 }
  0x67   : > { %v356_v63 = vrot.slane %v355_v61, 2  ;;  %v386_v0 = vrot.slane %v385_v62, 2 }
  0x69   : > { %v357_v1 = vadd.f32 %v356_v63, %v355_v61  ;;  %v387_v2 = vadd.f32 %v386_v0, %v385_v62 }
  0x6b   : > { %v358_v3 = vrot.slane %v357_v1, 1  ;;  %v388_v4 = vrot.slane %v387_v2, 1 }
  0x6d   : > { %v359_v5 = vadd.f32 %v358_v3, %v357_v1  ;;  %v389_v6 = vadd.f32 %v388_v4, %v387_v2 }
  0x6f   : > { %v391_v7 = vsel %vm390_vm0, %v359_v5, %v389_v6 }
  0x70   : > { %392 = vst [vmem:[%s297_s16] sm:$0x3] %v391_v7 }
  0x71   : > { %791 = shalt.err (!%p788_p11)
}
  0x72   : > { %578 = dma.vmem_to_hbm [thread:$0]  (%p961_p9), %s409_s15, 32, %s411_s26, %s394_s8  }
  0x73 PF: > { %s1212_s25 = sld [smem:[#allocation16_spill]] }
  0x74   : > { %s1213_s1 = sld [smem:[#allocation12_spill]] }
  0x79   : > { %p595_p13 = scmp.ge.s32.totalorder %s1212_s25, 2 }
  0x7a   : > { %s422_s14 = sand.u32 1, %s1213_s1  }
  0x7b   : > { %p591_p0 = pnand %p595_p13, %p967_p12  ;;  %s423_s12 = scalar_lea.sflag [#allocation4], %s422_s14 }
  0x7d   : > { %p592_p1 = pneg %p591_p0 }
  0x7f   : > { %833 = dma.done.wait (%p592_p1), %s423_s12, 32  }
  0x80   : > { %835 = vsyncadd (%p592_p1), %s423_s12, 4294967264  ;;  %s22_s19 = sadd.s32 1, %s1212_s25   ;;  %s1215_s17 = sld [smem:[#allocation13_spill]] }
  0x81   : > { %p19_p2 = scmp.ge.s32.totalorder %s22_s19, 10   ;;  %s1216_s14 = sld [smem:[#allocation20_spill]] }
  0x82   : > { %s1217_s15 = sld [smem:[#allocation14_spill]]  ;;  %s1221_s12 = smov %s842_s13 }
  0x83   : > { %s1218_s16 = sld [smem:[#allocation15_spill]] }
  0x84   : > { %s1219_s28 = sld [smem:[#allocation17_spill]] }
  0x85   : > { %s1220_s18 = sld [smem:[#allocation18_spill]] }
  0x86   : > { %s1222_s13 = smov %s1215_s17  ;;  %21 = sbr.rel (!%p19_p2) target bundleno = 11 (0xb), region = 101 }
  0x8a   : > { %s1223_s17 = smov %s1219_s28 }
  0x8b   :  { %429 = vsyncpa [#allocation3], 1 }
  0x8c   :  { %431 = vsyncpa [#allocation3 + $0x1], 1 }
  0x8d   :  { %432 = vsyncpa [#allocation6], 1 }
  0x8e   :  { %434 = vsyncpa [#allocation6 + $0x1], 1 }
  0x8f   :  { %435 = vsyncpa [#allocation4], 1 }
  0x90   :  { %437 = vsyncpa [#allocation4 + $0x1], 1 }

</bundles_post_ra>
